<compile_context>
chip_gen: v7x
topology: tpu7x:2x2x1
jax: 0.10.0
libtpu: 0.0.40
codegen_flags: <defaults>
</compile_context>

<pallas_src>
import jax
import jax.numpy as jnp
from jax.experimental import pallas as pl
from jax.experimental.pallas import tpu as pltpu


def _round_up(x, m):
    return ((x + m - 1) // m) * m


# ---------------------------------------------------------------------------
# Single-step kernels:  v = -0.8 + (v_prev * v_decay + z @ W + b) * 1.3
# ---------------------------------------------------------------------------
def _lif_step_kernel(z_ref, w_ref, b_ref, vdecay_ref, vprev_ref, v_ref, acc_ref):
    k = pl.program_id(2)

    @pl.when(k == 0)
    def _():
        acc_ref[...] = jnp.zeros_like(acc_ref)

    # bf16 operands, f32 accumulation on the MXU.
    acc_ref[...] += jnp.dot(z_ref[...], w_ref[...],
                            preferred_element_type=jnp.float32)

    @pl.when(k == pl.num_programs(2) - 1)
    def _():
        i = acc_ref[...] + b_ref[...]
        v = -0.8 + (vprev_ref[...] * vdecay_ref[...] + i) * 1.3
        v_ref[...] = v.astype(v_ref.dtype)


def _lif_step_kernel_zero_state(z_ref, w_ref, b_ref, v_ref, acc_ref):
    # state=None branch: v_prev == 0, so the decay term vanishes — no zero
    # membrane tensor is allocated or DMA'd.
    k = pl.program_id(2)

    @pl.when(k == 0)
    def _():
        acc_ref[...] = jnp.zeros_like(acc_ref)

    acc_ref[...] += jnp.dot(z_ref[...], w_ref[...],
                            preferred_element_type=jnp.float32)

    @pl.when(k == pl.num_programs(2) - 1)
    def _():
        i = acc_ref[...] + b_ref[...]
        v_ref[...] = (-0.8 + i * 1.3).astype(v_ref.dtype)


def lif_no_thres_forward(z, w, b, v_decay, v_prev=None, *,
                         tm=None, tn=None, tk=None):
    """Fused Linear synapse + LIF_no_thres membrane update (single time step).

    z       : [B, IN]   (cast to bf16 for the MXU; accumulation stays f32)
    w       : [IN, S]   synapse weight (transposed vs. torch Linear's [S, IN])
    b       : [S]       synapse bias
    v_decay : [S]       learnable decay
    v_prev  : [B, S] or None   (state.v)

    Returns (v, state_v) with v == state_v, both float32 [B, S].
    """
    B, IN = z.shape
    S = w.shape[1]

    # Tile selection.  Caps are v7x-safe (64 MiB physical / 32 MiB scoped VMEM):
    # the double-buffered working set at tm=256, tn=512, tk=512 is ~4 MiB.
    # tn is a multiple of 128 (lane-dense output stores on the single vst slot).
    if tm is None:
        tm = min(_round_up(B, 8), 256)
    if tn is None:
        tn = min(_round_up(S, 128), 512)
    if tk is None:
        tk = min(_round_up(IN, 128), 512)

    Bp = _round_up(B, tm)
    Sp = _round_up(S, tn)
    Kp = _round_up(IN, tk)

    zb = jnp.pad(z.astype(jnp.bfloat16), ((0, Bp - B), (0, Kp - IN)))
    wb = jnp.pad(w.astype(jnp.bfloat16), ((0, Kp - IN), (0, Sp - S)))
    b2 = jnp.pad(b.astype(jnp.float32).reshape(1, S), ((0, 0), (0, Sp - S)))

    grid = (Bp // tm, Sp // tn, Kp // tk)

    z_spec = pl.BlockSpec((tm, tk), lambda i, j, k: (i, k))
    w_spec = pl.BlockSpec((tk, tn), lambda i, j, k: (k, j))
    row_spec = pl.BlockSpec((1, tn), lambda i, j, k: (0, j))    # bias / v_decay
    bs_spec = pl.BlockSpec((tm, tn), lambda i, j, k: (i, j))    # v_prev / v out

    compiler_params = pltpu.CompilerParams(
        dimension_semantics=("parallel", "parallel", "arbitrary"))

    if v_prev is None:
        cost = pl.CostEstimate(
            flops=2 * Bp * Kp * Sp,
            transcendentals=0,
            bytes_accessed=(zb.size * 2 + wb.size * 2 + b2.size * 4
                            + Bp * Sp * 4))
        v_pad = pl.pallas_call(
            _lif_step_kernel_zero_state,
            out_shape=jax.ShapeDtypeStruct((Bp, Sp), jnp.float32),
            grid=grid,
            in_specs=[z_spec, w_spec, row_spec],
            out_specs=bs_spec,
            scratch_shapes=[pltpu.VMEM((tm, tn), jnp.float32)],
            compiler_params=compiler_params,
            cost_estimate=cost,
        )(zb, wb, b2)
    else:
        vd2 = jnp.pad(v_decay.astype(jnp.float32).reshape(1, S),
                      ((0, 0), (0, Sp - S)))
        vp = jnp.pad(v_prev.astype(jnp.float32), ((0, Bp - B), (0, Sp - S)))
        cost = pl.CostEstimate(
            flops=2 * Bp * Kp * Sp,
            transcendentals=0,
            bytes_accessed=(zb.size * 2 + wb.size * 2 + b2.size * 4
                            + vd2.size * 4 + vp.size * 4 + Bp * Sp * 4))
        v_pad = pl.pallas_call(
            _lif_step_kernel,
            out_shape=jax.ShapeDtypeStruct((Bp, Sp), jnp.float32),
            grid=grid,
            in_specs=[z_spec, w_spec, row_spec, row_spec, bs_spec],
            out_specs=bs_spec,
            scratch_shapes=[pltpu.VMEM((tm, tn), jnp.float32)],
            compiler_params=compiler_params,
            cost_estimate=cost,
            # membrane state updates in place when the caller donates it
            input_output_aliases={4: 0},
        )(zb, wb, b2, vd2, vp)

    v = v_pad[:B, :S]
    return v, v


# ---------------------------------------------------------------------------
# Time-fused rollout: membrane state stays resident in VMEM across T steps.
# ---------------------------------------------------------------------------
def _lif_seq_kernel(z_ref, w_ref, b_ref, vdecay_ref, v0_ref, vseq_ref,
                    vstate_ref):
    t = pl.program_id(0)

    @pl.when(t == 0)
    def _():
        vstate_ref[...] = v0_ref[...]

    i = jnp.dot(z_ref[0], w_ref[...], preferred_element_type=jnp.float32)
    i = i + b_ref[...]
    v = -0.8 + (vstate_ref[...] * vdecay_ref[...] + i) * 1.3
    vstate_ref[...] = v
    vseq_ref[0] = v.astype(vseq_ref.dtype)


def lif_no_thres_seq(z_seq, w, b, v_decay, v0=None):
    """Time-fused LIF_no_thres rollout.

    z_seq : [T, B, IN]  -> returns v_seq [T, B, S] (float32), one pallas_call.
    W / bias / v_decay / v0 have constant index_maps, so they are DMA'd once
    and stay resident across the whole sequence; only z_t streams in and v_t
    streams out per step.
    """
    # TODO(synk): tile IN/S inside the per-step body (pltpu.emit_pipeline) for
    # layers whose full W / state do not fit in VMEM.
    T, B, IN = z_seq.shape
    S = w.shape[1]
    if v0 is None:
        v0 = jnp.zeros((B, S), jnp.float32)

    zb = z_seq.astype(jnp.bfloat16)
    wb = w.astype(jnp.bfloat16)
    b2 = b.astype(jnp.float32).reshape(1, S)
    vd2 = v_decay.astype(jnp.float32).reshape(1, S)
    v0 = v0.astype(jnp.float32)

    cost = pl.CostEstimate(
        flops=2 * T * B * IN * S,
        transcendentals=0,
        bytes_accessed=(zb.size * 2 + wb.size * 2 + b2.size * 4 + vd2.size * 4
                        + v0.size * 4 + T * B * S * 4))

    return pl.pallas_call(
        _lif_seq_kernel,
        out_shape=jax.ShapeDtypeStruct((T, B, S), jnp.float32),
        grid=(T,),
        in_specs=[
            pl.BlockSpec((1, B, IN), lambda t: (t, 0, 0)),   # z_t   (streamed)
            pl.BlockSpec((IN, S), lambda t: (0, 0)),         # W     (resident)
            pl.BlockSpec((1, S), lambda t: (0, 0)),          # bias  (resident)
            pl.BlockSpec((1, S), lambda t: (0, 0)),          # decay (resident)
            pl.BlockSpec((B, S), lambda t: (0, 0)),          # v0    (resident)
        ],
        out_specs=pl.BlockSpec((1, B, S), lambda t: (t, 0, 0)),
        scratch_shapes=[pltpu.VMEM((B, S), jnp.float32)],
        compiler_params=pltpu.CompilerParams(
            dimension_semantics=("arbitrary",)),   # time is a recurrence
        cost_estimate=cost,
    )(zb, wb, b2, vd2, v0)


if __name__ == "__main__":
    key = jax.random.PRNGKey(0)
    k_z, k_w, k_b, k_d, k_v, k_s = jax.random.split(key, 6)

    B, IN, SIZE, T = 16, 256, 256, 6

    z = jax.random.normal(k_z, (B, IN), dtype=jnp.float32)
    # synapse = Linear(IN, SIZE): torch default init ~ U(-1/sqrt(IN), 1/sqrt(IN))
    bound = IN ** -0.5
    w = jax.random.uniform(k_w, (IN, SIZE), minval=-bound, maxval=bound,
                           dtype=jnp.float32)
    b = jax.random.uniform(k_b, (SIZE,), minval=-bound, maxval=bound,
                           dtype=jnp.float32)
    # v_decay ~ U(0.3, 0.4) as in the module __init__
    v_decay = jax.random.uniform(k_d, (SIZE,), minval=0.3, maxval=0.4,
                                 dtype=jnp.float32)
    v_prev = jax.random.normal(k_v, (B, SIZE), dtype=jnp.float32)
    z_seq = jax.random.normal(k_s, (T, B, IN), dtype=jnp.float32)

    # References.  The kernels use bf16 operands with f32 accumulation, so the
    # reference matmuls use bf16-rounded operands too.
    zf = z.astype(jnp.bfloat16).astype(jnp.float32)
    wf = w.astype(jnp.bfloat16).astype(jnp.float32)
    i_ref = zf @ wf + b[None, :]
    v_ref = -0.8 + (v_prev * v_decay[None, :] + i_ref) * 1.3
    v0_ref = -0.8 + i_ref * 1.3

    # 1) single step, default (largest-fit) tiles
    v, state_v = lif_no_thres_forward(z, w, b, v_decay, v_prev)
    jax.block_until_ready(v)
    assert jnp.allclose(v, v_ref, atol=5e-3, rtol=5e-3), "step (default tiles)"
    assert jnp.allclose(state_v, v), "state mismatch"

    # 2) single step, forced small tiles -> exercises the (2,2,2) grid with the
    #    K-axis accumulator / pl.when init-finalize path
    v_small, _ = lif_no_thres_forward(z, w, b, v_decay, v_prev,
                                      tm=8, tn=128, tk=128)
    jax.block_until_ready(v_small)
    assert jnp.allclose(v_small, v_ref, atol=5e-3, rtol=5e-3), "step (tiled grid)"

    # 3) state=None branch (zero-state kernel, no zero tensor materialized)
    v0, _ = lif_no_thres_forward(z, w, b, v_decay, None)
    jax.block_until_ready(v0)
    assert jnp.allclose(v0, v0_ref, atol=5e-3, rtol=5e-3), "step (zero state)"

    # 4) time-fused rollout
    v_seq = lif_no_thres_seq(z_seq, w, b, v_decay)
    jax.block_until_ready(v_seq)
    vv = jnp.zeros((B, SIZE), jnp.float32)
    seq_ref = []
    for t in range(T):
        i_t = z_seq[t].astype(jnp.bfloat16).astype(jnp.float32) @ wf + b[None, :]
        vv = -0.8 + (vv * v_decay[None, :] + i_t) * 1.3
        seq_ref.append(vv)
    seq_ref = jnp.stack(seq_ref)
    assert jnp.allclose(v_seq, seq_ref, atol=5e-3, rtol=5e-3), "time-fused rollout"

    print("KERNEL_OK")
</pallas_src>

<mosaic_0001>
module attributes {stable_mosaic.version = 11 : i64} {
  func.func @_lif_step_kernel(%arg0: i32, %arg1: i32, %arg2: i32, %arg3: memref<16x256xbf16, #tpu.memory_space<vmem>>, %arg4: memref<256x256xbf16, #tpu.memory_space<vmem>>, %arg5: memref<1x256xf32, #tpu.memory_space<vmem>>, %arg6: memref<1x256xf32, #tpu.memory_space<vmem>>, %arg7: memref<16x256xf32, #tpu.memory_space<vmem>>, %arg8: memref<16x256xf32, #tpu.memory_space<vmem>>, %arg9: memref<16x256xf32, #tpu.memory_space<vmem>>) attributes {dimension_semantics = [#tpu.dimension_semantics<parallel>, #tpu.dimension_semantics<parallel>, #tpu.dimension_semantics<arbitrary>], iteration_bounds = array<i64: 1, 1, 1>, scalar_prefetch = 0 : i64, scratch_operands = 1 : i64, tpu.core_type = #tpu.core_type<tc>, window_params = [{transform_indices = @transform_0, window_bounds = array<i64: 16, 256>}, {transform_indices = @transform_1, window_bounds = array<i64: 256, 256>}, {transform_indices = @transform_2, window_bounds = array<i64: 1, 256>}, {transform_indices = @transform_3, window_bounds = array<i64: 1, 256>}, {transform_indices = @transform_4, window_bounds = array<i64: 16, 256>}, {transform_indices = @transform_5, window_bounds = array<i64: 16, 256>}]} {
    %c0_i32 = arith.constant 0 : i32
    %0 = arith.cmpi eq, %arg2, %c0_i32 : i32
    %1 = arith.extui %0 : i1 to i32
    %c0_i32_0 = arith.constant 0 : i32
    %2 = arith.cmpi ne, %1, %c0_i32_0 : i32
    scf.if %2 {
      %cst_10 = arith.constant 0.000000e+00 : f32
      %12 = vector.broadcast %cst_10 : f32 to vector<16x256xf32>
      %c0_11 = arith.constant 0 : index
      %c0_12 = arith.constant 0 : index
      %13 = vector.load %arg9[%c0_11, %c0_12] : memref<16x256xf32, #tpu.memory_space<vmem>>, vector<16x256xf32>
      tpu.vector_store %arg9[%c0_11, %c0_12], %12 {strides = array<i32>} : memref<16x256xf32, #tpu.memory_space<vmem>>, vector<16x256xf32>,
    } else {
    }
    %c0 = arith.constant 0 : index
    %c0_1 = arith.constant 0 : index
    %3 = vector.load %arg9[%c0, %c0_1] : memref<16x256xf32, #tpu.memory_space<vmem>>, vector<16x256xf32>
    %c0_2 = arith.constant 0 : index
    %c0_3 = arith.constant 0 : index
    %4 = vector.load %arg3[%c0_2, %c0_3] : memref<16x256xbf16, #tpu.memory_space<vmem>>, vector<16x256xbf16>
    %c0_4 = arith.constant 0 : index
    %c0_5 = arith.constant 0 : index
    %5 = vector.load %arg4[%c0_4, %c0_5] : memref<256x256xbf16, #tpu.memory_space<vmem>>, vector<256x256xbf16>
    %cst = arith.constant dense<0.000000e+00> : vector<16x256xf32>
    %6 = tpu.matmul %4, %5, %cst {dimension_numbers = #tpu.dot_dimension_numbers<[1], [0], [0], [1], [0, 0, 1, 1], [], []>} : vector<16x256xbf16>, vector<256x256xbf16>, vector<16x256xf32> -> vector<16x256xf32>
    %7 = arith.addf %3, %6 : vector<16x256xf32>
    %c0_6 = arith.constant 0 : index
    %c0_7 = arith.constant 0 : index
    %8 = vector.load %arg9[%c0_6, %c0_7] : memref<16x256xf32, #tpu.memory_space<vmem>>, vector<16x256xf32>
    tpu.vector_store %arg9[%c0_6, %c0_7], %7 {strides = array<i32>} : memref<16x256xf32, #tpu.memory_space<vmem>>, vector<16x256xf32>,
    %c0_i32_8 = arith.constant 0 : i32
    %9 = arith.cmpi eq, %arg2, %c0_i32_8 : i32
    %10 = arith.extui %9 : i1 to i32
    %c0_i32_9 = arith.constant 0 : i32
    %11 = arith.cmpi ne, %10, %c0_i32_9 : i32
    scf.if %11 {
      %c0_10 = arith.constant 0 : index
      %c0_11 = arith.constant 0 : index
      %12 = vector.load %arg9[%c0_10, %c0_11] : memref<16x256xf32, #tpu.memory_space<vmem>>, vector<16x256xf32>
      %c0_12 = arith.constant 0 : index
      %c0_13 = arith.constant 0 : index
      %13 = vector.load %arg5[%c0_12, %c0_13] : memref<1x256xf32, #tpu.memory_space<vmem>>, vector<1x256xf32>
      %14 = vector.broadcast %13 : vector<1x256xf32> to vector<16x256xf32>
      %15 = arith.addf %12, %14 : vector<16x256xf32>
      %c0_14 = arith.constant 0 : index
      %c0_15 = arith.constant 0 : index
      %16 = vector.load %arg7[%c0_14, %c0_15] : memref<16x256xf32, #tpu.memory_space<vmem>>, vector<16x256xf32>
      %c0_16 = arith.constant 0 : index
      %c0_17 = arith.constant 0 : index
      %17 = vector.load %arg6[%c0_16, %c0_17] : memref<1x256xf32, #tpu.memory_space<vmem>>, vector<1x256xf32>
      %18 = vector.broadcast %17 : vector<1x256xf32> to vector<16x256xf32>
      %19 = arith.mulf %16, %18 : vector<16x256xf32>
      %20 = arith.addf %19, %15 : vector<16x256xf32>
      %cst_18 = arith.constant 1.300000e+00 : f32
      %21 = vector.broadcast %cst_18 : f32 to vector<16x256xf32>
      %22 = arith.mulf %20, %21 : vector<16x256xf32>
      %cst_19 = arith.constant -8.000000e-01 : f32
      %23 = vector.broadcast %cst_19 : f32 to vector<16x256xf32>
      %24 = arith.addf %23, %22 : vector<16x256xf32>
      %c0_20 = arith.constant 0 : index
      %c0_21 = arith.constant 0 : index
      %25 = vector.load %arg8[%c0_20, %c0_21] : memref<16x256xf32, #tpu.memory_space<vmem>>, vector<16x256xf32>
      tpu.vector_store %arg8[%c0_20, %c0_21], %24 {strides = array<i32>} : memref<16x256xf32, #tpu.memory_space<vmem>>, vector<16x256xf32>,
    } else {
    }
    return
  }
  func.func @transform_0(%arg0: i32, %arg1: i32, %arg2: i32) -> (i32, i32) {
    %c0_i32 = arith.constant 0 : i32
    return %arg0, %arg2 : i32, i32
  }
  func.func @transform_1(%arg0: i32, %arg1: i32, %arg2: i32) -> (i32, i32) {
    %c0_i32 = arith.constant 0 : i32
    return %arg2, %arg1 : i32, i32
  }
  func.func @transform_2(%arg0: i32, %arg1: i32, %arg2: i32) -> (i32, i32) {
    %c0_i32 = arith.constant 0 : i32
    %c0_i32_0 = arith.constant 0 : i32
    return %c0_i32, %arg1 : i32, i32
  }
  func.func @transform_3(%arg0: i32, %arg1: i32, %arg2: i32) -> (i32, i32) {
    %c0_i32 = arith.constant 0 : i32
    %c0_i32_0 = arith.constant 0 : i32
    return %c0_i32, %arg1 : i32, i32
  }
  func.func @transform_4(%arg0: i32, %arg1: i32, %arg2: i32) -> (i32, i32) {
    %c0_i32 = arith.constant 0 : i32
    return %arg0, %arg1 : i32, i32
  }
  func.func @transform_5(%arg0: i32, %arg1: i32, %arg2: i32) -> (i32, i32) {
    %c0_i32 = arith.constant 0 : i32
    return %arg0, %arg1 : i32, i32
  }
}

</mosaic_0001>

<bundles_post_ra>
// kernel: tpu_custom_call.1
= control target key start
LH: loop header
LB: loop body
LE: loop exit
PB: predicated region body
PF: predicated region fallthrough
CT: control target
= control target key end

     0   :  { %10 = vsyncpa [#allocation4], 0  ;;  %s648_s0 = inlined_call_operand.vmem [shape: bf16[16,256], index: 0, kind: input, shape index: {}]   ;;  %s649_s1 = inlined_call_operand.hbm [shape: bf16[256,256], index: 1, kind: input, shape index: {}]   ;;  %s650_s2 = inlined_call_operand.vmem [shape: f32[1,256], index: 2, kind: input, shape index: {}]   ;;  %s651_s3 = inlined_call_operand.vmem [shape: f32[1,256], index: 3, kind: input, shape index: {}]   ;;  %s652_s4 = inlined_call_operand.hbm [shape: f32[16,256], index: 4, kind: input, shape index: {}, may-alias: {4,5}]   ;;  %s653_s5 = inlined_call_operand.hbm [shape: f32[16,256], index: 5, kind: output, shape index: {}, may-alias: {4,5}]  }
   0x1   :  { %11 = vsyncpa [#allocation7], 0 }
   0x2   :  { %12 = vsyncpa [#allocation5], 0  ;;  %s557_s18 = smov [#allocation3]   ;;  %s485_s22 = scalar_lea.hbm %s649_s1, 4096 }
   0x3   :  { %s20_s19 = sshll.u32 %s557_s18, 4  ;;  %p486_p0 = scmp.ne.s32.totalorder %s649_s1, %s485_s22  ;;  %s21_s19 = int_to_ptr.vmem [resolvable:$true] %s20_s19 }
   0x4   :  { %p489_p1 = scmp.lt.u32.totalorder %s485_s22, %s649_s1 }
   0x6   :  { %p491_p2 = pnand %p489_p1, %p486_p0 }
   0x8   :  { %494 = shalt.err (!%p491_p2)
}
   0x9   :  { %s495_s27 = scalar_lea.vmem %s21_s19, 4096  ;;  %p500_p4 = scmp.lt.s32.totalorder %s21_s19, %s21_s19 }
   0xa   :  { %p496_p3 = scmp.ne.s32.totalorder %s21_s19, %s495_s27  ;;  %p501_p5 = scmp.lt.s32.totalorder %s495_s27, %s495_s27 }
   0xc   :  { %p502_p6 = por %p501_p5, %p500_p4 }
   0xe   :  { %p503_p7 = pnand %p502_p6, %p496_p3 }
  0x10   :  { %506 = shalt.err (!%p503_p7)
}
  0x11   :  { %s558_s28 = smov 128   ;;  %s559_s29 = smov 8  }
  0x12   :  { %26 = dma.hbm_to_vmem [thread:$0]  %s649_s1, 4096, %s21_s19, [#allocation4], %s558_s28, %s558_s28, %s559_s29  }
  0x13   :  { %s560_s7 = smov [#allocation6]   ;;  %s507_s11 = scalar_lea.hbm %s652_s4, 512 }
  0x14   :  { %s36_s8 = sshll.u32 %s560_s7, 4  ;;  %p508_p8 = scmp.ne.s32.totalorder %s652_s4, %s507_s11  ;;  %s37_s8 = int_to_ptr.vmem [resolvable:$true] %s36_s8 }
  0x15   :  { %p511_p9 = scmp.lt.u32.totalorder %s507_s11, %s652_s4 }
  0x17   :  { %p513_p10 = pnand %p511_p9, %p508_p8 }
  0x19   :  { %516 = shalt.err (!%p513_p10)
}
  0x1a   :  { %s517_s16 = scalar_lea.vmem %s37_s8, 512  ;;  %p522_p12 = scmp.lt.s32.totalorder %s37_s8, %s37_s8 }
  0x1b   :  { %p518_p11 = scmp.ne.s32.totalorder %s37_s8, %s517_s16  ;;  %p523_p13 = scmp.lt.s32.totalorder %s517_s16, %s517_s16 }
  0x1d   :  { %p524_p0 = por %p523_p13, %p522_p12 }
  0x1f   :  { %p525_p1 = pnand %p524_p0, %p518_p11 }
  0x21   :  { %528 = shalt.err (!%p525_p1)
}
  0x22   :  { %s561_s1 = smov 256   ;;  %s562_s17 = smov 16  }
  0x23   :  { %42 = dma.hbm_to_vmem [thread:$0]  %s652_s4, 512, %s37_s8, [#allocation7], %s561_s1, %s561_s1, %s562_s17  }
  0x24   :  { %551 = dma.done.wait [#allocation4], 4096  }
  0x25   :  { %552 = vsyncadd [#allocation4], 4294963200 }
  0x26   :  { %553 = dma.done.wait [#allocation7], 512  }
  0x27   :  { %554 = vsyncadd [#allocation7], 4294966784  ;;  %v434_v0 = vld [vmem:[#allocation3 + $0x4] ss:$8 sps:$4 sm:$0xff]   ;;  %v436_v1 = vld [vmem:[#allocation3] ss:$8 sps:$4 sm:$0xff]   ;;  %v325_v34 = vlaneseq }
  0x28   :  { %265 = vmatprep.subr.bf16.mxu0 %v434_v0  ;;  %v437_v2 = vld [vmem:[#allocation3 + $0x14] ss:$8 sps:$4 sm:$0xff]   ;;  %v439_v3 = vld [vmem:[#allocation3 + $0x10] ss:$8 sps:$4 sm:$0xff]   ;;  %v440_v4 = vld [vmem:[#allocation3 + $0x24] ss:$8 sps:$4 sm:$0xff]  }
  0x29   :  { %266 = vmatpush1.bf16.msra.mxu0 %v436_v1  ;;  %v442_v5 = vld [vmem:[#allocation3 + $0x20] ss:$8 sps:$4 sm:$0xff]   ;;  %v443_v6 = vld [vmem:[#allocation3 + $0x34] ss:$8 sps:$4 sm:$0xff]   ;;  %v445_v7 = vld [vmem:[#allocation3 + $0x30] ss:$8 sps:$4 sm:$0xff]  }
  0x2a   :  { %267 = vmatprep.subr.bf16.mxu0 %v437_v2  ;;  %v446_v8 = vld [vmem:[#allocation3 + $0x44] ss:$8 sps:$4 sm:$0xff]   ;;  %v448_v9 = vld [vmem:[#allocation3 + $0x40] ss:$8 sps:$4 sm:$0xff]   ;;  %v449_v10 = vld [vmem:[#allocation3 + $0x54] ss:$8 sps:$4 sm:$0xff]  }
  0x2b   :  { %v451_v11 = vld [vmem:[#allocation3 + $0x50] ss:$8 sps:$4 sm:$0xff]   ;;  %v452_v12 = vld [vmem:[#allocation3 + $0x64] ss:$8 sps:$4 sm:$0xff]   ;;  %v454_v14 = vld [vmem:[#allocation3 + $0x60] ss:$8 sps:$4 sm:$0xff]  }
  0x2c   :  { %v484_v13 = vld [vmem:[%s648_s0 + $0x4] ss:$8 sps:$4 sm:$0xff]   ;;  %v455_v15 = vld [vmem:[#allocation3 + $0x74] ss:$8 sps:$4 sm:$0xff]   ;;  %v457_v16 = vld [vmem:[#allocation3 + $0x70] ss:$8 sps:$4 sm:$0xff]  }
  0x2d   :  { %268 = vmatpush1.bf16.msra.mxu0 %v439_v3  ;;  %297 = vmatprep.mubr.bf16.mxu0 %v484_v13  ;;  %v458_v17 = vld [vmem:[#allocation3 + $0x84] ss:$8 sps:$4 sm:$0xff]   ;;  %v460_v18 = vld [vmem:[#allocation3 + $0x80] ss:$8 sps:$4 sm:$0xff]   ;;  %v461_v19 = vld [vmem:[#allocation3 + $0x94] ss:$8 sps:$4 sm:$0xff]  }
  0x2e   :  { %269 = vmatprep.subr.bf16.mxu0 %v440_v4  ;;  %v463_v20 = vld [vmem:[#allocation3 + $0x90] ss:$8 sps:$4 sm:$0xff]   ;;  %v464_v21 = vld [vmem:[#allocation3 + $0xa4] ss:$8 sps:$4 sm:$0xff]   ;;  %v466_v22 = vld [vmem:[#allocation3 + $0xa0] ss:$8 sps:$4 sm:$0xff]  }
  0x2f   :  { %v467_v23 = vld [vmem:[#allocation3 + $0xb4] ss:$8 sps:$4 sm:$0xff]   ;;  %v469_v24 = vld [vmem:[#allocation3 + $0xb0] ss:$8 sps:$4 sm:$0xff]   ;;  %v470_v25 = vld [vmem:[#allocation3 + $0xc4] ss:$8 sps:$4 sm:$0xff]  }
  0x30   :  { %v472_v26 = vld [vmem:[#allocation3 + $0xc0] ss:$8 sps:$4 sm:$0xff]   ;;  %v473_v27 = vld [vmem:[#allocation3 + $0xd4] ss:$8 sps:$4 sm:$0xff]   ;;  %v475_v28 = vld [vmem:[#allocation3 + $0xd0] ss:$8 sps:$4 sm:$0xff]  }
  0x31   :  { %270 = vmatpush1.bf16.msra.mxu0 %v442_v5  ;;  %v476_v29 = vld [vmem:[#allocation3 + $0xe4] ss:$8 sps:$4 sm:$0xff]   ;;  %v478_v30 = vld [vmem:[#allocation3 + $0xe0] ss:$8 sps:$4 sm:$0xff]   ;;  %v479_v31 = vld [vmem:[#allocation3 + $0xf4] ss:$8 sps:$4 sm:$0xff]  }
  0x32   :  { %271 = vmatprep.subr.bf16.mxu0 %v443_v6  ;;  %v481_v32 = vld [vmem:[#allocation3 + $0xf0] ss:$8 sps:$4 sm:$0xff]   ;;  %v482_v33 = vld [vmem:[%s648_s0] ss:$8 sps:$4 sm:$0xff]   ;;  %v326_v35 = vshrl.u32 %v325_v34, 7  ;;  %s563_s0 = smov [#allocation8]  }
  0x33   :  { %v343_v37 = vld [vmem:[%s651_s3] sm:$0x3]  ;;  %v340_v44 = vld [vmem:[#allocation6 + $0x8] sm:$0xff]  ;;  %v341_v46 = vld [vmem:[#allocation6 + $0x10] sm:$0xff] }
  0x34   :  { %v327_v36 = vsub.s32 0, %v326_v35  ;;  %v331_v38 = vsub.s32 1, %v326_v35  ;;  %v323_v39 = vld [vmem:[%s650_s2] sm:$0x3]  ;;  %v342_v48 = vld [vmem:[#allocation6 + $0x18] sm:$0xff]  ;;  %s380_s2 = sshll.u32 %s563_s0, 4  ;;  %s381_s2 = int_to_ptr.vmem [resolvable:$true] %s380_s2 }
  0x35   :  { %272 = vmatpush1.bf16.msra.mxu0 %v445_v7  ;;  %v339_v41 = vld [vmem:[#allocation6] sm:$0xff]  ;;  %s529_s3 = scalar_lea.vmem %s381_s2, 512  ;;  %p534_p3 = scmp.lt.s32.totalorder %s381_s2, %s381_s2 }
  0x36   :  { %273 = vmatprep.subr.bf16.mxu0 %v446_v8  ;;  %v348_v40 = vrot.slane %v343_v37, %v327_v36  ;;  %v352_v42 = vrot.slane %v343_v37, %v331_v38  ;;  %v328_v43 = vrot.slane %v323_v39, %v327_v36  ;;  %v332_v45 = vrot.slane %v323_v39, %v331_v38  ;;  %p530_p2 = scmp.ne.s32.totalorder %s381_s2, %s529_s3  ;;  %p535_p4 = scmp.lt.s32.totalorder %s529_s3, %s529_s3 }
  0x38   :  { %v355_v47 = vmul.f32 %v348_v40, %v339_v41  ;;  %v356_v50 = vmul.f32 %v352_v42, %v340_v44  ;;  %v357_v53 = vmul.f32 %v348_v40, %v341_v46  ;;  %v358_v56 = vmul.f32 %v352_v42, %v342_v48  ;;  %p536_p5 = por %p535_p4, %p534_p3 }
  0x39   :  { %274 = vmatpush1.bf16.msra.mxu0 %v448_v9 }
  0x3a   :  { %275 = vmatprep.subr.bf16.mxu0 %v449_v10  ;;  %p537_p6 = pnand %p536_p5, %p530_p2 }
  0x3d   :  { %276 = vmatpush1.bf16.msra.mxu0 %v451_v11 }
  0x3e   :  { %277 = vmatprep.subr.bf16.mxu0 %v452_v12 }
  0x41   :  { %278 = vmatpush1.bf16.msra.mxu0 %v454_v14 }
  0x42   :  { %279 = vmatprep.subr.bf16.mxu0 %v455_v15 }
  0x45   :  { %280 = vmatpush1.bf16.msra.mxu0 %v457_v16 }
  0x46   :  { %281 = vmatprep.subr.bf16.mxu0 %v458_v17 }
  0x49   :  { %282 = vmatpush1.bf16.msra.mxu0 %v460_v18 }
  0x4a   :  { %283 = vmatprep.subr.bf16.mxu0 %v461_v19 }
  0x4d   :  { %284 = vmatpush1.bf16.msra.mxu0 %v463_v20 }
  0x4e   :  { %285 = vmatprep.subr.bf16.mxu0 %v464_v21 }
  0x51   :  { %286 = vmatpush1.bf16.msra.mxu0 %v466_v22 }
  0x52   :  { %287 = vmatprep.subr.bf16.mxu0 %v467_v23 }
  0x55   :  { %288 = vmatpush1.bf16.msra.mxu0 %v469_v24 }
  0x56   :  { %289 = vmatprep.subr.bf16.mxu0 %v470_v25 }
  0x59   :  { %290 = vmatpush1.bf16.msra.mxu0 %v472_v26 }
  0x5a   :  { %291 = vmatprep.subr.bf16.mxu0 %v473_v27 }
  0x5d   :  { %292 = vmatpush1.bf16.msra.mxu0 %v475_v28 }
  0x5e   :  { %293 = vmatprep.subr.bf16.mxu0 %v476_v29 }
  0x61   :  { %294 = vmatpush1.bf16.msra.mxu0 %v478_v30 }
  0x62   :  { %295 = vmatprep.subr.bf16.mxu0 %v479_v31 }
  0x65   :  { %296 = vmatpush1.bf16.msra.mxu0 %v481_v32 }
  0x68   :  { %298 = vmatmul.mubr.bf16.vlgmr.msra.gmra.mrb[0].mxu0 %v482_v33 }
 0x13b   :  { %v299_v49 = vpop.f32.mrb[0].mxu0 }
 0x13c   :  { %v335_v51 = vadd.f32 %v328_v43, %v299_v49  ;;  %v301_v52 = vpop.f32.mrb[1].mxu0 }
 0x13d   :  { %v336_v54 = vadd.f32 %v332_v45, %v301_v52  ;;  %v303_v55 = vpop.f32.mrb[2].mxu0 }
 0x13e   :  { %v359_v57 = vadd.f32 %v355_v47, %v335_v51  ;;  %v337_v58 = vadd.f32 %v328_v43, %v303_v55  ;;  %v305_v59 = vpop.f32.mrb[3].mxu0 }
 0x13f   :  { %v360_v60 = vadd.f32 %v356_v50, %v336_v54  ;;  %v338_v61 = vadd.f32 %v332_v45, %v305_v59 }
 0x140   :  { %v363_v62 = vmul.f32 1.3, %v359_v57  ;;  %v361_v63 = vadd.f32 %v357_v53, %v337_v58 }
 0x141   :  { %v364_v0 = vmul.f32 1.3, %v360_v60  ;;  %v362_v1 = vadd.f32 %v358_v56, %v338_v61 }
 0x142   :  { %v367_v2 = vadd.f32 -0.8, %v363_v62  ;;  %v365_v3 = vmul.f32 1.3, %v361_v63 }
 0x143   :  { %v368_v4 = vadd.f32 -0.8, %v364_v0  ;;  %v366_v5 = vmul.f32 1.3, %v362_v1 }
 0x144   :  { %371 = vst [vmem:[#allocation8] sm:$0xff] %v367_v2  ;;  %v369_v6 = vadd.f32 -0.8, %v365_v3 }
 0x145   :  { %372 = vst [vmem:[#allocation8 + $0x8] sm:$0xff] %v368_v4  ;;  %v370_v7 = vadd.f32 -0.8, %v366_v5 }
 0x146   :  { %373 = vst [vmem:[#allocation8 + $0x10] sm:$0xff] %v369_v6 }
 0x147   :  { %374 = vst [vmem:[#allocation8 + $0x18] sm:$0xff] %v370_v7 }
 0x148   :  { %540 = shalt.err (!%p537_p6)
}
 0x149   :  { %s541_s29 = scalar_lea.hbm %s653_s5, 512 }
 0x14a   :  { %p542_p7 = scmp.ne.s32.totalorder %s653_s5, %s541_s29  ;;  %p545_p8 = scmp.lt.u32.totalorder %s541_s29, %s653_s5 }
 0x14c   :  { %p547_p9 = pnand %p545_p8, %p542_p7 }
 0x14e   :  { %550 = shalt.err (!%p547_p9)
}
 0x14f   :  { %386 = dma.vmem_to_hbm [thread:$0]  %s381_s2, 512, %s653_s5, [#allocation5], %s561_s1, %s561_s1, %s562_s17  }
 0x150   :  { %555 = dma.done.wait [#allocation5], 512  }
 0x151   :  { %556 = vsyncadd [#allocation5], 4294966784 }
 0x152   :  { %390 = vsyncpa [#allocation4], 1 }
 0x153   :  { %391 = vsyncpa [#allocation7], 1 }
 0x154   :  { %392 = vsyncpa [#allocation5], 1 }

</bundles_post_ra>
